<compile_context>
chip_gen: v7x
topology: tpu7x:2x2x1
jax: 0.10.0
libtpu: 0.0.40
codegen_flags: <defaults>
</compile_context>

<pallas_src>
import numpy as np
import jax
import jax.numpy as jnp
from jax.experimental import pallas as pl
from jax.experimental.pallas import tpu as pltpu


def make_swav_loss_kernel(crops_for_assign, num_crops_total, batch_size,
                          temperature, epsilon, sinkhorn_iterations):
    """Builds the Pallas kernel with all hyper-parameters baked in as constants."""
    V = int(num_crops_total)
    B = int(batch_size)
    crops = tuple(int(c) for c in crops_for_assign)
    NC = len(crops)
    inv_eps = np.float32(1.0 / epsilon)
    inv_temp = np.float32(1.0 / temperature)
    final_scale = np.float32(1.0 / (NC * (V - 1)))

    def kernel(order_ref, x_ref, out_ref, q_ref, acc_ref):
        # order_ref : SMEM int32[NC+V]   scalar-prefetched view schedule (index_map only)
        # x_ref     : VMEM [B, K]        current view block (native dtype)
        # out_ref   : SMEM f32[1, 1]     final scalar loss
        # q_ref     : VMEM f32[NC, B, K] cached Sinkhorn assignments (persist across grid)
        # acc_ref   : SMEM f32[1, 1]     scalar loss accumulator
        del order_ref  # only consumed by the index_maps
        g = pl.program_id(0)

        @pl.when(g == 0)
        def _init():
            acc_ref[0, 0] = jnp.float32(0.0)

        # Upcast right after the load; keep all math in f32 (v5e has no bf16 VPU).
        x = x_ref[...].astype(jnp.float32)                       # (B, K)

        # ---------------- phase 1: Sinkhorn on assignment crops ----------------
        @pl.when(g < NC)
        def _sinkhorn():
            K = x.shape[1]
            logits = x * inv_eps
            if sinkhorn_iterations > 0:
                # Global-max subtraction: a constant scale on Q, exactly
                # cancelled by the first Sinkhorn normalisation; prevents
                # exp overflow for hot scores.
                logits = logits - jnp.max(logits)
            # Work on Qt = Q.T (shape [B, K]) to avoid XLU transposes;
            # row/col sums of Q map to col/row sums of Qt.
            qt = jnp.exp(logits)
            for _ in range(sinkhorn_iterations):
                col = jnp.sum(qt, axis=0, keepdims=True)          # (1, K): Q row sums
                qt = qt * pl.reciprocal(col * jnp.float32(K))     # folds the /K
                row = jnp.sum(qt, axis=1, keepdims=True)          # (B, 1): Q col sums
                qt = qt * pl.reciprocal(row * jnp.float32(B))     # folds the /B
            qv = qt * jnp.float32(B)                              # rows sum to ~1
            for i in range(NC):                                   # static store slot
                @pl.when(g == i)
                def _store(i=i, qv=qv):
                    q_ref[i] = qv

        # --------------- phase 2: cross-entropy against cached q ---------------
        @pl.when(g >= NC)
        def _cross_entropy():
            v = g - NC                                            # actual view index
            xs = x * inv_temp
            x_max = jnp.max(xs, axis=1, keepdims=True)
            lse = jnp.log(jnp.sum(jnp.exp(xs - x_max), axis=1,
                                  keepdims=True)) + x_max         # (B, 1), computed once per view
            l_v = jnp.mean(lse)
            # rows of q sum to 1  =>  sum(q * log_softmax(x)) == sum(q * xs) - lse,
            # so -mean(sum(q*log_p)) == mean(lse) - mean(sum(q*xs)).
            for i, c in enumerate(crops):
                @pl.when(v != c)
                def _acc(i=i):
                    t = jnp.mean(jnp.sum(q_ref[i] * xs, axis=1, keepdims=True))
                    acc_ref[0, 0] += l_v - t

        @pl.when(g == pl.num_programs(0) - 1)
        def _finalize():
            out_ref[0, 0] = acc_ref[0, 0] * final_scale

    return kernel


def swav_loss(student_output, *, crops_for_assign, num_crops, batch_size,
              temperature, epsilon, sinkhorn_iterations):
    """Wrapper: grid over (assignment crops + views), (B, K) blocks, scalar out."""
    V = int(np.sum(num_crops))
    B = int(batch_size)
    K = int(student_output.shape[1])
    crops = tuple(int(c) for c in crops_for_assign)
    NC = len(crops)

    kernel = make_swav_loss_kernel(crops, V, B, temperature, epsilon,
                                   sinkhorn_iterations)

    # Schedule: first the assignment crops (Sinkhorn phase), then every view
    # (cross-entropy phase). Scalar-prefetched so the index_map picks the right
    # (B, K) block for each grid step.
    view_order = jnp.asarray(list(crops) + list(range(V)), dtype=jnp.int32)

    loss = pl.pallas_call(
        kernel,
        out_shape=jax.ShapeDtypeStruct((1, 1), jnp.float32),
        grid_spec=pltpu.PrefetchScalarGridSpec(
            num_scalar_prefetch=1,
            grid=(NC + V,),
            in_specs=[
                pl.BlockSpec((B, K), lambda g, order: (order[g], 0)),
            ],
            out_specs=pl.BlockSpec((1, 1), lambda g, order: (0, 0),
                                   memory_space=pltpu.MemorySpace.SMEM),
            scratch_shapes=[
                pltpu.VMEM((NC, B, K), jnp.float32),   # cached q per assignment crop
                pltpu.SMEM((1, 1), jnp.float32),       # scalar loss accumulator
            ],
        ),
        compiler_params=pltpu.CompilerParams(
            dimension_semantics=("arbitrary",)),       # sequential: q + accumulator carry
    )(view_order, student_output)
    return loss[0, 0]


def swav_loss_ref(student_output, *, crops_for_assign, num_crops, batch_size,
                  temperature, epsilon, sinkhorn_iterations):
    """Pure-JAX reference mirroring the PyTorch forward (queue disabled)."""
    V = int(np.sum(num_crops))
    B = batch_size
    total_loss = 0.0
    for crop_id in crops_for_assign:
        out = student_output[B * crop_id:B * (crop_id + 1)]
        Q = jnp.exp(out / epsilon).T
        Bq, Kq = Q.shape[1], Q.shape[0]
        for _ in range(sinkhorn_iterations):
            Q = Q / jnp.sum(Q, axis=1, keepdims=True)
            Q = Q / Kq
            Q = Q / jnp.sum(Q, axis=0, keepdims=True)
            Q = Q / Bq
        q = (Q * Bq).T[-B:]
        subloss = 0.0
        for v in np.delete(np.arange(V), crop_id):
            x = student_output[B * v:B * (v + 1)] / temperature
            subloss -= jnp.mean(jnp.sum(q * jax.nn.log_softmax(x, axis=1), axis=1))
        total_loss += subloss / (V - 1)
    return total_loss / len(crops_for_assign)


if __name__ == "__main__":
    # Module configuration (queue disabled -> queue_length = 0).
    crops_for_assign = [0, 1]
    num_crops = [2, 2]                 # sum = 4 views
    batch_size = 8
    num_prototypes = 128               # lane-dense last dim (multiple of 128)
    head_output_dim = 32               # embedding dim (only used by the queue branch)
    temperature = 0.1
    epsilon = 0.05
    sinkhorn_iterations = 3

    V = int(np.sum(num_crops))

    key = jax.random.PRNGKey(0)
    k_scores, k_emb, k_proto = jax.random.split(key, 3)

    # Prototype scores (cosine-similarity scale), grouped by crop along rows.
    student_scores = 0.1 * jax.random.normal(
        k_scores, (V * batch_size, num_prototypes), dtype=jnp.float32)
    # Embedding + prototype weights are only consumed by the (disabled) queue
    # branch; constructed to match the module's API, then dropped.
    embedding = jax.random.normal(
        k_emb, (V * batch_size, head_output_dim), dtype=jnp.float32)
    prototypes_weight = 0.02 * jax.random.normal(
        k_proto, (num_prototypes, head_output_dim), dtype=jnp.float32)
    del embedding, prototypes_weight  # unused with queue_length == 0

    loss = swav_loss(
        student_scores,
        crops_for_assign=crops_for_assign,
        num_crops=num_crops,
        batch_size=batch_size,
        temperature=temperature,
        epsilon=epsilon,
        sinkhorn_iterations=sinkhorn_iterations,
    )
    loss = jax.block_until_ready(loss)

    loss_ref = swav_loss_ref(
        student_scores,
        crops_for_assign=crops_for_assign,
        num_crops=num_crops,
        batch_size=batch_size,
        temperature=temperature,
        epsilon=epsilon,
        sinkhorn_iterations=sinkhorn_iterations,
    )
    np.testing.assert_allclose(np.asarray(loss), np.asarray(loss_ref),
                               rtol=1e-4, atol=1e-5)
    print("KERNEL_OK")
</pallas_src>

<mosaic_0001>
module attributes {stable_mosaic.version = 11 : i64} {
  func.func @kernel(%arg0: i32, %arg1: memref<6xi32, #tpu.memory_space<smem>>, %arg2: memref<8x128xf32, #tpu.memory_space<vmem>>, %arg3: memref<1x1xf32, #tpu.memory_space<smem>>, %arg4: memref<2x8x128xf32, #tpu.memory_space<vmem>>, %arg5: memref<1x1xf32, #tpu.memory_space<smem>>) attributes {dimension_semantics = [#tpu.dimension_semantics<arbitrary>], iteration_bounds = array<i64: 6>, scalar_prefetch = 1 : i64, scratch_operands = 2 : i64, tpu.core_type = #tpu.core_type<tc>, window_params = [{transform_indices = @transform_0, window_bounds = array<i64: 8, 128>}, {transform_indices = @transform_1, window_bounds = array<i64: 1, 1>}]} {
    %c0_i32 = arith.constant 0 : i32
    %0 = arith.cmpi eq, %arg0, %c0_i32 : i32
    %1 = arith.extui %0 : i1 to i32
    %c0_i32_0 = arith.constant 0 : i32
    %2 = arith.cmpi ne, %1, %c0_i32_0 : i32
    scf.if %2 {
      %cst = arith.constant 0.000000e+00 : f32
      %c0_6 = arith.constant 0 : index
      %c0_7 = arith.constant 0 : index
      %13 = memref.load %arg5[%c0_6, %c0_7] : memref<1x1xf32, #tpu.memory_space<smem>>
      memref.store %cst, %arg5[%c0_6, %c0_7] : memref<1x1xf32, #tpu.memory_space<smem>>
    } else {
    }
    %c0 = arith.constant 0 : index
    %c0_1 = arith.constant 0 : index
    %3 = vector.load %arg2[%c0, %c0_1] : memref<8x128xf32, #tpu.memory_space<vmem>>, vector<8x128xf32>
    %c2_i32 = arith.constant 2 : i32
    %4 = arith.cmpi slt, %arg0, %c2_i32 : i32
    %5 = arith.extui %4 : i1 to i32
    %c0_i32_2 = arith.constant 0 : i32
    %6 = arith.cmpi ne, %5, %c0_i32_2 : i32
    scf.if %6 {
      %cst = arith.constant 2.000000e+01 : f32
      %13 = vector.broadcast %cst : f32 to vector<8x128xf32>
      %14 = arith.mulf %3, %13 : vector<8x128xf32>
      %15 = vector.shape_cast %14 : vector<8x128xf32> to vector<1x8x128xf32>
      %cst_6 = arith.constant dense<0xFF800000> : vector<1xf32>
      %16 = vector.multi_reduction <maximumf>, %15, %cst_6 [1, 2] : vector<1x8x128xf32> to vector<1xf32>
      %17 = vector.shape_cast %16 : vector<1xf32> to vector<1x1x1xf32>
      %18 = vector.extract %17[0, 0, 0] : f32 from vector<1x1x1xf32>
      %19 = vector.broadcast %18 : f32 to vector<8x128xf32>
      %20 = arith.subf %14, %19 : vector<8x128xf32>
      %21 = math.exp %20 : vector<8x128xf32>
      %cst_7 = arith.constant dense<0.000000e+00> : vector<128xf32>
      %22 = vector.multi_reduction <add>, %21, %cst_7 [0] : vector<8x128xf32> to vector<128xf32>
      %23 = vector.shape_cast %22 : vector<128xf32> to vector<1x128xf32>
      %cst_8 = arith.constant 1.280000e+02 : f32
      %24 = vector.broadcast %cst_8 : f32 to vector<1x128xf32>
      %25 = arith.mulf %23, %24 : vector<1x128xf32>
      %26 = tpu.reciprocal %25 : vector<1x128xf32> -> vector<1x128xf32>
      %27 = vector.broadcast %26 : vector<1x128xf32> to vector<8x128xf32>
      %28 = arith.mulf %21, %27 : vector<8x128xf32>
      %cst_9 = arith.constant dense<0.000000e+00> : vector<8xf32>
      %29 = vector.multi_reduction <add>, %28, %cst_9 [1] : vector<8x128xf32> to vector<8xf32>
      %30 = vector.shape_cast %29 : vector<8xf32> to vector<8x1xf32>
      %cst_10 = arith.constant 8.000000e+00 : f32
      %31 = vector.broadcast %cst_10 : f32 to vector<8x1xf32>
      %32 = arith.mulf %30, %31 : vector<8x1xf32>
      %33 = tpu.reciprocal %32 : vector<8x1xf32> -> vector<8x1xf32>
      %34 = vector.broadcast %33 : vector<8x1xf32> to vector<8x128xf32>
      %35 = arith.mulf %28, %34 : vector<8x128xf32>
      %cst_11 = arith.constant dense<0.000000e+00> : vector<128xf32>
      %36 = vector.multi_reduction <add>, %35, %cst_11 [0] : vector<8x128xf32> to vector<128xf32>
      %37 = vector.shape_cast %36 : vector<128xf32> to vector<1x128xf32>
      %cst_12 = arith.constant 1.280000e+02 : f32
      %38 = vector.broadcast %cst_12 : f32 to vector<1x128xf32>
      %39 = arith.mulf %37, %38 : vector<1x128xf32>
      %40 = tpu.reciprocal %39 : vector<1x128xf32> -> vector<1x128xf32>
      %41 = vector.broadcast %40 : vector<1x128xf32> to vector<8x128xf32>
      %42 = arith.mulf %35, %41 : vector<8x128xf32>
      %cst_13 = arith.constant dense<0.000000e+00> : vector<8xf32>
      %43 = vector.multi_reduction <add>, %42, %cst_13 [1] : vector<8x128xf32> to vector<8xf32>
      %44 = vector.shape_cast %43 : vector<8xf32> to vector<8x1xf32>
      %cst_14 = arith.constant 8.000000e+00 : f32
      %45 = vector.broadcast %cst_14 : f32 to vector<8x1xf32>
      %46 = arith.mulf %44, %45 : vector<8x1xf32>
      %47 = tpu.reciprocal %46 : vector<8x1xf32> -> vector<8x1xf32>
      %48 = vector.broadcast %47 : vector<8x1xf32> to vector<8x128xf32>
      %49 = arith.mulf %42, %48 : vector<8x128xf32>
      %cst_15 = arith.constant dense<0.000000e+00> : vector<128xf32>
      %50 = vector.multi_reduction <add>, %49, %cst_15 [0] : vector<8x128xf32> to vector<128xf32>
      %51 = vector.shape_cast %50 : vector<128xf32> to vector<1x128xf32>
      %cst_16 = arith.constant 1.280000e+02 : f32
      %52 = vector.broadcast %cst_16 : f32 to vector<1x128xf32>
      %53 = arith.mulf %51, %52 : vector<1x128xf32>
      %54 = tpu.reciprocal %53 : vector<1x128xf32> -> vector<1x128xf32>
      %55 = vector.broadcast %54 : vector<1x128xf32> to vector<8x128xf32>
      %56 = arith.mulf %49, %55 : vector<8x128xf32>
      %cst_17 = arith.constant dense<0.000000e+00> : vector<8xf32>
      %57 = vector.multi_reduction <add>, %56, %cst_17 [1] : vector<8x128xf32> to vector<8xf32>
      %58 = vector.shape_cast %57 : vector<8xf32> to vector<8x1xf32>
      %cst_18 = arith.constant 8.000000e+00 : f32
      %59 = vector.broadcast %cst_18 : f32 to vector<8x1xf32>
      %60 = arith.mulf %58, %59 : vector<8x1xf32>
      %61 = tpu.reciprocal %60 : vector<8x1xf32> -> vector<8x1xf32>
      %62 = vector.broadcast %61 : vector<8x1xf32> to vector<8x128xf32>
      %63 = arith.mulf %56, %62 : vector<8x128xf32>
      %cst_19 = arith.constant 8.000000e+00 : f32
      %64 = vector.broadcast %cst_19 : f32 to vector<8x128xf32>
      %65 = arith.mulf %63, %64 : vector<8x128xf32>
      %c0_i32_20 = arith.constant 0 : i32
      %66 = arith.cmpi eq, %arg0, %c0_i32_20 : i32
      %67 = arith.extui %66 : i1 to i32
      %c0_i32_21 = arith.constant 0 : i32
      %68 = arith.cmpi ne, %67, %c0_i32_21 : i32
      scf.if %68 {
        %c0_23 = arith.constant 0 : index
        %c0_24 = arith.constant 0 : index
        %c0_25 = arith.constant 0 : index
        %72 = vector.load %arg4[%c0_23, %c0_24, %c0_25] : memref<2x8x128xf32, #tpu.memory_space<vmem>>, vector<1x8x128xf32>
        %73 = vector.shape_cast %72 : vector<1x8x128xf32> to vector<8x128xf32>
        %74 = vector.shape_cast %65 : vector<8x128xf32> to vector<1x8x128xf32>
        tpu.vector_store %arg4[%c0_23, %c0_24, %c0_25], %74 {strides = array<i32>} : memref<2x8x128xf32, #tpu.memory_space<vmem>>, vector<1x8x128xf32>,
      } else {
      }
      %c1_i32 = arith.constant 1 : i32
      %69 = arith.cmpi eq, %arg0, %c1_i32 : i32
      %70 = arith.extui %69 : i1 to i32
      %c0_i32_22 = arith.constant 0 : i32
      %71 = arith.cmpi ne, %70, %c0_i32_22 : i32
      scf.if %71 {
        %c1 = arith.constant 1 : index
        %c0_23 = arith.constant 0 : index
        %c0_24 = arith.constant 0 : index
        %72 = vector.load %arg4[%c1, %c0_23, %c0_24] : memref<2x8x128xf32, #tpu.memory_space<vmem>>, vector<1x8x128xf32>
        %73 = vector.shape_cast %72 : vector<1x8x128xf32> to vector<8x128xf32>
        %74 = vector.shape_cast %65 : vector<8x128xf32> to vector<1x8x128xf32>
        tpu.vector_store %arg4[%c1, %c0_23, %c0_24], %74 {strides = array<i32>} : memref<2x8x128xf32, #tpu.memory_space<vmem>>, vector<1x8x128xf32>,
      } else {
      }
    } else {
    }
    %c2_i32_3 = arith.constant 2 : i32
    %7 = arith.cmpi sge, %arg0, %c2_i32_3 : i32
    %8 = arith.extui %7 : i1 to i32
    %c0_i32_4 = arith.constant 0 : i32
    %9 = arith.cmpi ne, %8, %c0_i32_4 : i32
    scf.if %9 {
      %c2_i32_6 = arith.constant 2 : i32
      %13 = arith.subi %arg0, %c2_i32_6 : i32
      %cst = arith.constant 1.000000e+01 : f32
      %14 = vector.broadcast %cst : f32 to vector<8x128xf32>
      %15 = arith.mulf %3, %14 : vector<8x128xf32>
      %cst_7 = arith.constant dense<0xFF800000> : vector<8xf32>
      %16 = vector.multi_reduction <maximumf>, %15, %cst_7 [1] : vector<8x128xf32> to vector<8xf32>
      %17 = vector.shape_cast %16 : vector<8xf32> to vector<8x1xf32>
      %18 = vector.broadcast %17 : vector<8x1xf32> to vector<8x128xf32>
      %19 = arith.subf %15, %18 : vector<8x128xf32>
      %20 = math.exp %19 : vector<8x128xf32>
      %cst_8 = arith.constant dense<0.000000e+00> : vector<8xf32>
      %21 = vector.multi_reduction <add>, %20, %cst_8 [1] : vector<8x128xf32> to vector<8xf32>
      %22 = vector.shape_cast %21 : vector<8xf32> to vector<8x1xf32>
      %23 = math.log %22 : vector<8x1xf32>
      %24 = arith.addf %23, %17 : vector<8x1xf32>
      %25 = vector.shape_cast %24 : vector<8x1xf32> to vector<1x8x1xf32>
      %cst_9 = arith.constant dense<0.000000e+00> : vector<1xf32>
      %26 = vector.multi_reduction <add>, %25, %cst_9 [1, 2] : vector<1x8x1xf32> to vector<1xf32>
      %27 = vector.shape_cast %26 : vector<1xf32> to vector<1x1x1xf32>
      %28 = vector.extract %27[0, 0, 0] : f32 from vector<1x1x1xf32>
      %cst_10 = arith.constant 8.000000e+00 : f32
      %29 = arith.divf %28, %cst_10 : f32
      %c0_i32_11 = arith.constant 0 : i32
      %30 = arith.cmpi ne, %13, %c0_i32_11 : i32
      %31 = arith.extui %30 : i1 to i32
      %c0_i32_12 = arith.constant 0 : i32
      %32 = arith.cmpi ne, %31, %c0_i32_12 : i32
      scf.if %32 {
        %c0_14 = arith.constant 0 : index
        %c0_15 = arith.constant 0 : index
        %c0_16 = arith.constant 0 : index
        %36 = vector.load %arg4[%c0_14, %c0_15, %c0_16] : memref<2x8x128xf32, #tpu.memory_space<vmem>>, vector<1x8x128xf32>
        %37 = vector.shape_cast %36 : vector<1x8x128xf32> to vector<8x128xf32>
        %38 = arith.mulf %37, %15 : vector<8x128xf32>
        %cst_17 = arith.constant dense<0.000000e+00> : vector<8xf32>
        %39 = vector.multi_reduction <add>, %38, %cst_17 [1] : vector<8x128xf32> to vector<8xf32>
        %40 = vector.shape_cast %39 : vector<8xf32> to vector<8x1xf32>
        %41 = vector.shape_cast %40 : vector<8x1xf32> to vector<1x8x1xf32>
        %cst_18 = arith.constant dense<0.000000e+00> : vector<1xf32>
        %42 = vector.multi_reduction <add>, %41, %cst_18 [1, 2] : vector<1x8x1xf32> to vector<1xf32>
        %43 = vector.shape_cast %42 : vector<1xf32> to vector<1x1x1xf32>
        %44 = vector.extract %43[0, 0, 0] : f32 from vector<1x1x1xf32>
        %cst_19 = arith.constant 8.000000e+00 : f32
        %45 = arith.divf %44, %cst_19 : f32
        %c0_20 = arith.constant 0 : index
        %c0_21 = arith.constant 0 : index
        %46 = memref.load %arg5[%c0_20, %c0_21] : memref<1x1xf32, #tpu.memory_space<smem>>
        %47 = arith.subf %29, %45 : f32
        %48 = arith.addf %46, %47 : f32
        %c0_22 = arith.constant 0 : index
        %c0_23 = arith.constant 0 : index
        %49 = memref.load %arg5[%c0_22, %c0_23] : memref<1x1xf32, #tpu.memory_space<smem>>
        memref.store %48, %arg5[%c0_22, %c0_23] : memref<1x1xf32, #tpu.memory_space<smem>>
      } else {
      }
      %c1_i32 = arith.constant 1 : i32
      %33 = arith.cmpi ne, %13, %c1_i32 : i32
      %34 = arith.extui %33 : i1 to i32
      %c0_i32_13 = arith.constant 0 : i32
      %35 = arith.cmpi ne, %34, %c0_i32_13 : i32
      scf.if %35 {
        %c1 = arith.constant 1 : index
        %c0_14 = arith.constant 0 : index
        %c0_15 = arith.constant 0 : index
        %36 = vector.load %arg4[%c1, %c0_14, %c0_15] : memref<2x8x128xf32, #tpu.memory_space<vmem>>, vector<1x8x128xf32>
        %37 = vector.shape_cast %36 : vector<1x8x128xf32> to vector<8x128xf32>
        %38 = arith.mulf %37, %15 : vector<8x128xf32>
        %cst_16 = arith.constant dense<0.000000e+00> : vector<8xf32>
        %39 = vector.multi_reduction <add>, %38, %cst_16 [1] : vector<8x128xf32> to vector<8xf32>
        %40 = vector.shape_cast %39 : vector<8xf32> to vector<8x1xf32>
        %41 = vector.shape_cast %40 : vector<8x1xf32> to vector<1x8x1xf32>
        %cst_17 = arith.constant dense<0.000000e+00> : vector<1xf32>
        %42 = vector.multi_reduction <add>, %41, %cst_17 [1, 2] : vector<1x8x1xf32> to vector<1xf32>
        %43 = vector.shape_cast %42 : vector<1xf32> to vector<1x1x1xf32>
        %44 = vector.extract %43[0, 0, 0] : f32 from vector<1x1x1xf32>
        %cst_18 = arith.constant 8.000000e+00 : f32
        %45 = arith.divf %44, %cst_18 : f32
        %c0_19 = arith.constant 0 : index
        %c0_20 = arith.constant 0 : index
        %46 = memref.load %arg5[%c0_19, %c0_20] : memref<1x1xf32, #tpu.memory_space<smem>>
        %47 = arith.subf %29, %45 : f32
        %48 = arith.addf %46, %47 : f32
        %c0_21 = arith.constant 0 : index
        %c0_22 = arith.constant 0 : index
        %49 = memref.load %arg5[%c0_21, %c0_22] : memref<1x1xf32, #tpu.memory_space<smem>>
        memref.store %48, %arg5[%c0_21, %c0_22] : memref<1x1xf32, #tpu.memory_space<smem>>
      } else {
      }
    } else {
    }
    %c5_i32 = arith.constant 5 : i32
    %10 = arith.cmpi eq, %arg0, %c5_i32 : i32
    %11 = arith.extui %10 : i1 to i32
    %c0_i32_5 = arith.constant 0 : i32
    %12 = arith.cmpi ne, %11, %c0_i32_5 : i32
    scf.if %12 {
      %c0_6 = arith.constant 0 : index
      %c0_7 = arith.constant 0 : index
      %13 = memref.load %arg5[%c0_6, %c0_7] : memref<1x1xf32, #tpu.memory_space<smem>>
      %cst = arith.constant 0.166666672 : f32
      %14 = arith.mulf %13, %cst : f32
      %c0_8 = arith.constant 0 : index
      %c0_9 = arith.constant 0 : index
      %15 = memref.load %arg3[%c0_8, %c0_9] : memref<1x1xf32, #tpu.memory_space<smem>>
      memref.store %14, %arg3[%c0_8, %c0_9] : memref<1x1xf32, #tpu.memory_space<smem>>
    } else {
    }
    return
  }
  func.func @transform_0(%arg0: i32, %arg1: memref<6xi32, #tpu.memory_space<smem>>) -> (i32, i32) {
    %0 = arith.index_cast %arg0 : i32 to index
    %1 = memref.load %arg1[%0] : memref<6xi32, #tpu.memory_space<smem>>
    %c0_i32 = arith.constant 0 : i32
    %c0_i32_0 = arith.constant 0 : i32
    return %1, %c0_i32 : i32, i32
  }
  func.func @transform_1(%arg0: i32, %arg1: memref<6xi32, #tpu.memory_space<smem>>) -> (i32, i32) {
    %c0_i32 = arith.constant 0 : i32
    %c0_i32_0 = arith.constant 0 : i32
    %c0_i32_1 = arith.constant 0 : i32
    return %c0_i32, %c0_i32_0 : i32, i32
  }
}

</mosaic_0001>

<bundles_post_ra>
// kernel: tpu_custom_call.1
= control target key start
LH: loop header
LB: loop body
LE: loop exit
PB: predicated region body
PF: predicated region fallthrough
CT: control target
= control target key end

     0   :  { %s719_s0 = inlined_call_operand.hbm [shape: s32[6], index: 0, kind: input, shape index: {}]   ;;  %s720_s1 = inlined_call_operand.hbm [shape: f32[32,128], index: 1, kind: input, shape index: {}]   ;;  %s721_s2 = inlined_call_operand.hbm [shape: f32[1,1], index: 2, kind: output, shape index: {}]  }
   0x1   :  { %s458_s11 = scalar_lea.hbm %s719_s0, 16 }
   0x2   :  { %p459_p0 = scmp.ne.s32.totalorder %s719_s0, %s458_s11  ;;  %p462_p1 = scmp.lt.u32.totalorder %s458_s11, %s719_s0 }
   0x4   :  { %p464_p2 = pnand %p462_p1, %p459_p0 }
   0x6   :  { %467 = shalt.err (!%p464_p2)  }
   0x7   :  { %s552_s16 = smov [#allocation5]  }
   0x8   :  { %8 = dma.hbm_to_smem %s719_s0, 16, %s552_s16, [#allocation4] }
   0x9   :  { %526 = dma.done.wait [#allocation4], 16 }
   0xa   :  { %527 = vsyncadd [#allocation4], 4294967280 }
   0xb   :  { %10 = sfence }
   0xc   :  { %11 = vsyncpa [#allocation7], 0 }
   0xd   :  { %13 = vsyncpa [#allocation7 + $0x1], 0 }
   0xe   :  { %14 = vsyncpa [#allocation8], 0  ;;  %s583_s19 = smov 0   ;;  %s585_s20 = smov 0  }
   0xf   :  { %s587_s21 = smov 0   ;;  %s589_s22 = smov 0  }
  0x10 LB: > { %s599_s0 = sadd.s32 4294967295, %s550_s22   ;;  %s601_s23 = sadd.s32 1, %s550_s22   ;;  %s550_s22 = sphi %s589_s22, %s732_s22   ;;  %s546_s21 = sphi %s587_s21, %s731_s21   ;;  %s542_s20 = sphi %s585_s20, %s730_s20   ;;  %s538_s19 = sphi %s583_s19, %s729_s19  }
  0x11   : > { %s24_s24 = sld [smem:[#allocation5 + %s550_s22]]  ;;  %p36_p3 = scmp.ne.s32.totalorder %s546_s21, %s542_s20 }
  0x12   : > { %s25_s25 = sld [smem:[#allocation5 + %s601_s23]]  ;;  %p37_p4 = scmp.eq.s32.totalorder %s550_s22, 0 }
  0x13   : > { %p42_p5 = scmp.ne.s32.totalorder %s542_s20, %s538_s19  ;;  %p722_p6 = scmp.eq.s32.totalorder %s599_s0, 0 }
  0x14   : > { %s29_s26 = sadd.s32 1, %s546_s21  ;;  %p38_p7 = por %p37_p4, %p36_p3 }
  0x15   : > { %p611_p8 = por %p722_p6, %p42_p5  ;;  %s87_s28 = sand.u32 1, %s546_s21  }
  0x16   : > { %p400_p9 = scmp.lt.s32.totalorder %s550_s22, 6  ;;  %s357_s30 = sshll.u32 %s87_s28, 3 }
  0x17   : > { %s724_s27 = scalar_select %p611_p8, 1, 0 }
  0x18   : > { %s26_s29 = ssub.s32 %s24_s24, %s25_s25  ;;  %p616_p11 = pnand %p400_p9, %p38_p7 }
  0x19   : > { %p27_p10 = scmp.eq.s32.totalorder %s26_s29, 0  ;;  %p359_p12 = scmp.ge.s32.totalorder %s550_s22, 1 }
  0x1a   : > { %s382_s5 = scalar_select %p38_p7, [#allocation5], [#allocation10] }
  0x1b   : > { %s621_s4 = scalar_select %p27_p10, %s546_s21, %s29_s26  }
  0x1c   : > { %s383_s6 = scalar_select %p38_p7, %s550_s22, 0 }
  0x1d   : > { %s734_s5 = smov (!%p400_p9, %s382_s5), [#allocation11]  ;;  %p104_p13 = scmp.lt.s32.totalorder %s550_s22, 7 }
  0x1e   : > { %s736_s6 = smov (!%p400_p9, %s383_s6), 0  ;;  %s91_s8 = scalar_lea.vmem [#allocation6], %s357_s30 }
  0x1f   : > { %s92_s7 = sld [smem:[%s734_s5 + %s736_s6]]  ;;  %s99_s9 = sshll.u32 %s91_s8, 4  ;;  %s627_s9 = int_to_ptr.vmem [resolvable:$true] %s99_s9 }
  0x20   : > { %p623_p0 = pnand %p359_p12, %p104_p13  ;;  %s88_s15 = scalar_lea.sflag [#allocation7], %s87_s28 }
  0x21   : > { %p470_p2 = pneg %p616_p11  ;;  %s473_s19 = scalar_lea.hbm %s720_s1, 512 }
  0x25   : > { %s358_s11 = sshll.u32 %s92_s7, 7 }
  0x26   : > { %s632_s14 = scalar_lea.hbm %s720_s1, %s358_s11 }
  0x27   : > { %s468_s16 = scalar_lea.hbm %s632_s14, 128  ;;  %p474_p5 = scmp.lt.u32.totalorder %s632_s14, %s720_s1 }
  0x28   : > { %p469_p1 = scmp.ne.s32.totalorder %s632_s14, %s468_s16  ;;  %p475_p7 = scmp.lt.u32.totalorder %s473_s19, %s468_s16 }
  0x29   : > { %p477_p10 = scmp.lt.u32.totalorder %s468_s16, %s632_s14 }
  0x2a   : > { %p471_p3 = pnand %p470_p2, %p469_p1  ;;  %p476_p9 = por %p475_p7, %p474_p5 }
  0x2c   : > { %p472_p4 = pneg %p471_p3  ;;  %p478_p12 = por %p477_p10, %p476_p9 }
  0x2e   : > { %p479_p13 = pnand %p478_p12, %p472_p4 }
  0x30   : > { %482 = shalt.err (!%p479_p13)
}
  0x31   : > { %s483_s25 = scalar_lea.vmem %s627_s9, 128  ;;  %s553_s26 = smov [#allocation6]  }
  0x32   : > { %p484_p1 = scmp.ne.s32.totalorder %s627_s9, %s483_s25  ;;  %s488_s28 = sshll.u32 %s553_s26, 4  ;;  %s489_s28 = int_to_ptr.vmem [resolvable:$false] %s488_s28 }
  0x33   : > { %s490_s29 = scalar_lea.vmem %s489_s28, 256  ;;  %p491_p8 = scmp.lt.s32.totalorder %s627_s9, %s489_s28 }
  0x34   : > { %p486_p3 = pnand %p484_p1, %p470_p2  ;;  %p492_p5 = scmp.lt.s32.totalorder %s490_s29, %s483_s25 }
  0x36   : > { %p487_p6 = pneg %p486_p3  ;;  %p493_p7 = por %p492_p5, %p491_p8 }
  0x38   : > { %p494_p9 = pnand %p493_p7, %p487_p6 }
  0x3a   : > { %497 = shalt.err (!%p494_p9)
}
  0x3b   : > { %399 = dma.hbm_to_vmem [thread:$0]  (!%p616_p11), %s632_s14, 128, %s627_s9, %s88_s15  }
  0x3c   : > { %108 = sbr.rel (%p623_p0) target bundleno = 1760 (0x6e0), region = 24  ;;  %s110_s30 = sand.u32 (!%p623_p0), 1, %s542_s20  }
  0x3d   : > { %s360_s5 = sshll.u32 (!%p623_p0), %s110_s30, 3  ;;  %s111_s6 = scalar_lea.sflag (!%p623_p0), [#allocation7], %s110_s30 }
  0x3e   : > { %s114_s7 = scalar_lea.vmem (!%p623_p0), [#allocation6], %s360_s5  ;;  %p727_p2 = scmp.ne.s32.totalorder (!%p623_p0), %s724_s27, 0 }
  0x43   : > { %529 = dma.done.wait (%p727_p2), %s111_s6, 128  }
  0x44   : > { %531 = vsyncadd (%p727_p2), %s111_s6, 4294967168  ;;  %p361_p6 = scmp.ne.s32.totalorder %s599_s0, 0  ;;  %s554_s3 = smov 0.0   ;;  %v669_v0 = vld [vmem:[%s114_s7] sm:$0xff] }
  0x45   : > { %p728_p8 = scmp.eq.s32.totalorder %s599_s0, 0  ;;  %p362_p11 = scmp.ge.s32.totalorder %s599_s0, 2 }
  0x46   : > { %v140_v1 = vmul.f32 (!%p362_p11), 20.0, %v669_v0 }
  0x47   : > { %387 = sst [smem:[#allocation3]] (%p728_p8), %s554_s3  ;;  %139 = sbr.rel (%p362_p11) target bundleno = 856 (0x358), region = 36 }
  0x48   : > { %141 = vmax.xlane.f32.xlu0 (!%p362_p11), %v140_v1 }
  0xd5   : > { %v142_v2 = vpop.xlane.xlu0 %141 }
  0xd6   : > { %v143_v3 = vrot.slane %v142_v2, 4 }
  0xd8   : > { %v144_v4 = vmax.f32 %v142_v2, %v143_v3 }
  0xda   : > { %v145_v5 = vrot.slane %v144_v4, 2 }
  0xdc   : > { %v146_v6 = vmax.f32 %v144_v4, %v145_v5 }
  0xde   : > { %v147_v7 = vrot.slane %v146_v6, 1 }
  0xe0   : > { %v148_v8 = vmax.f32 %v146_v6, %v147_v7 }
  0xe2   : > { %374 = vpush %v148_v8 }
 0x113   : > { %s375_s27 = spop %374 }
 0x114   : > { %v150_v9 = vstv %s375_s27 }
 0x115   : > { %v151_v10 = vsub.f32 %v140_v1, %v150_v9 }
 0x117   : > { %v152_v11 = vmul.f32 1.442695, %v151_v10 }
 0x119   : > { %440 = vpow2.f32 %v152_v11 }
 0x123   : > { %v441_v12 = vpop.eup %440 }
 0x124   : > { %v154_v13 = vrot.slane %v441_v12, 4 }
 0x126   : > { %v155_v14 = vadd.f32 %v441_v12, %v154_v13 }
 0x128   : > { %v156_v15 = vrot.slane %v155_v14, 2 }
 0x12a   : > { %v157_v16 = vadd.f32 %v156_v15, %v155_v14 }
 0x12c   : > { %v158_v17 = vrot.slane %v157_v16, 1 }
 0x12e   : > { %v159_v18 = vadd.f32 %v158_v17, %v157_v16 }
 0x130   : > { %v160_v19 = vmul.f32 128.0, %v159_v18 }
 0x132   : > { %442 = vrcp.f32 %v160_v19 }
 0x13c   : > { %v443_v20 = vpop.eup %442 }
 0x13d   : > { %v162_v21 = vmul.f32 %v443_v20, %v441_v12 }
 0x13f   : > { %163 = vadd.xlane.f32.xlu0 %v162_v21 }
 0x1cc   : > { %v164_v22 = vpop.xlane.xlu0 %163 }
 0x1cd   : > { %v165_v23 = vmul.f32 8.0, %v164_v22 }
 0x1cf   : > { %444 = vrcp.f32 %v165_v23 }
 0x1d9   : > { %v445_v24 = vpop.eup %444 }
 0x1da   : > { %v167_v25 = vmul.f32 %v445_v24, %v162_v21 }
 0x1dc   : > { %v168_v26 = vrot.slane %v167_v25, 4 }
 0x1de   : > { %v169_v27 = vadd.f32 %v168_v26, %v167_v25 }
 0x1e0   : > { %v170_v28 = vrot.slane %v169_v27, 2 }
 0x1e2   : > { %v171_v29 = vadd.f32 %v170_v28, %v169_v27 }
 0x1e4   : > { %v172_v30 = vrot.slane %v171_v29, 1 }
 0x1e6   : > { %v173_v31 = vadd.f32 %v172_v30, %v171_v29 }
 0x1e8   : > { %v174_v32 = vmul.f32 128.0, %v173_v31 }
 0x1ea   : > { %446 = vrcp.f32 %v174_v32 }
 0x1f4   : > { %v447_v33 = vpop.eup %446 }
 0x1f5   : > { %v176_v34 = vmul.f32 %v447_v33, %v167_v25 }
 0x1f7   : > { %177 = vadd.xlane.f32.xlu1 %v176_v34 }
 0x284   : > { %v178_v35 = vpop.xlane.xlu1 %177 }
 0x285   : > { %v179_v36 = vmul.f32 8.0, %v178_v35 }
 0x287   : > { %448 = vrcp.f32 %v179_v36 }
 0x291   : > { %v449_v37 = vpop.eup %448 }
 0x292   : > { %v181_v38 = vmul.f32 %v449_v37, %v176_v34 }
 0x294   : > { %v182_v39 = vrot.slane %v181_v38, 4 }
 0x296   : > { %v183_v40 = vadd.f32 %v182_v39, %v181_v38 }
 0x298   : > { %v184_v41 = vrot.slane %v183_v40, 2 }
 0x29a   : > { %v185_v42 = vadd.f32 %v184_v41, %v183_v40 }
 0x29c   : > { %v186_v43 = vrot.slane %v185_v42, 1 }
 0x29e   : > { %v187_v44 = vadd.f32 %v186_v43, %v185_v42 }
 0x2a0   : > { %v188_v45 = vmul.f32 128.0, %v187_v44 }
 0x2a2   : > { %450 = vrcp.f32 %v188_v45 }
 0x2ac   : > { %v451_v46 = vpop.eup %450 }
 0x2ad   : > { %v190_v47 = vmul.f32 %v451_v46, %v181_v38 }
 0x2af   : > { %191 = vadd.xlane.f32.xlu1 %v190_v47 }
 0x33c   : > { %v192_v48 = vpop.xlane.xlu1 %191 }
 0x33d   : > { %v193_v49 = vmul.f32 8.0, %v192_v48 }
 0x33f   : > { %452 = vrcp.f32 %v193_v49 }
 0x346   : > { %199 = sbr.rel (%p361_p6) target bundleno = 847 (0x34f), region = 40 }
 0x349   : > { %v453_v50 = vpop.eup %452 }
 0x34a   : > { %v195_v51 = vmul.f32 %v453_v50, %v190_v47 }
 0x34c   : > { %v196_v52 = vmul.f32 8.0, %v195_v51 }
 0x34e   : > { %200 = vst [vmem:[#allocation2] sm:$0xff] %v196_v52 }
 0x34f PF: > { %p364_p0 = scmp.ne.s32.totalorder %s599_s0, 1 }
 0x350   : > { %206 = vst [vmem:[#allocation2 + $0x8] sm:$0xff] (!%p364_p0), %v196_v52 }
 0x351   : > { %204 = sbr.rel (%p364_p0) target bundleno = 856 (0x358), region = 44 }
 0x358 PF: > { %p365_p4 = scmp.lt.s32.totalorder %s599_s0, 2 }
 0x359   : > { %v212_v53 = vmul.f32 (!%p365_p4), 10.0, %v669_v0  ;;  %vm223_vm0 = vcmask (!%p365_p4), 7168   ;;  %s366_s8 = sadd.s32 (!%p365_p4), 4294967294, %s599_s0 }
 0x35a   : > { %210 = sbr.rel (%p365_p4) target bundleno = 1744 (0x6d0), region = 48  ;;  %p367_p10 = scmp.eq.s32.totalorder (!%p365_p4), %s366_s8, 0 }
 0x35b   : > { %213 = vmax.xlane.f32.xlu0 (!%p365_p4), %v212_v53 }
 0x361   : > { %v241_v6 = vld [vmem:[#allocation2] sm:$0xff] (!%p367_p10)  ;;  %s258_s11 = sld [smem:[#allocation3]] (!%p367_p10) }
 0x362   : > { %v242_v7 = vmul.f32 (!%p367_p10), %v241_v6, %v212_v53 }
 0x3e8   : > { %v214_v54 = vpop.xlane.xlu0 %213 }
 0x3e9   : > { %v215_v55 = vsub.f32 %v212_v53, %v214_v54 }
 0x3eb   : > { %v216_v56 = vmul.f32 1.442695, %v215_v55 }
 0x3ed   : > { %454 = vpow2.f32 %v216_v56 }
 0x3f7   : > { %v455_v57 = vpop.eup %454 }
 0x3f8   : > { %218 = vadd.xlane.f32.xlu0 %v455_v57 }
 0x3fc   : > { %243 = vadd.xlane.f32.xlu0 (!%p367_p10), %v242_v7 }
 0x485   : > { %v219_v58 = vpop.xlane.xlu0 %218 }
 0x486   : > { %456 = vlog2.f32 %v219_v58 }
 0x489   : > { %v244_v8 = vpop.xlane.xlu0 (!%p367_p10), %243 }
 0x48a   : > { %v245_v9 = vsel (!%p367_p10), %vm223_vm0, %v244_v8, 0.0 }
 0x48b   : > { %246 = vadd.xlane.f32.xlu0 (!%p367_p10), %v245_v9 }
 0x490   : > { %v457_v59 = vpop.eup %456 }
 0x491   : > { %v221_v60 = vmul.f32 0.6931472, %v457_v59 }
 0x493   : > { %v222_v61 = vadd.f32 %v221_v60, %v214_v54 }
 0x495   : > { %v224_v62 = vsel %vm223_vm0, %v222_v61, 0.0 }
 0x496   : > { %225 = vadd.xlane.f32.xlu1 %v224_v62 }
 0x518   : > { %v247_v10 = vpop.xlane.xlu0 (!%p367_p10), %246 }
 0x519   : > { %v248_v11 = vrot.slane (!%p367_p10), %v247_v10, 4 }
 0x51b   : > { %v249_v12 = vadd.f32 (!%p367_p10), %v248_v11, %v247_v10 }
 0x51d   : > { %v250_v13 = vrot.slane (!%p367_p10), %v249_v12, 2 }
 0x51f   : > { %v251_v14 = vadd.f32 (!%p367_p10), %v250_v13, %v249_v12 }
 0x521   : > { %v252_v15 = vrot.slane (!%p367_p10), %v251_v14, 1 }
 0x523   : > { %v226_v63 = vpop.xlane.xlu1 %225  ;;  %v253_v16 = vadd.f32 (!%p367_p10), %v252_v15, %v251_v14 }
 0x524   : > { %v227_v0 = vrot.slane %v226_v63, 4 }
 0x526   : > { %v228_v1 = vadd.f32 %v227_v0, %v226_v63 }
 0x528   : > { %v229_v2 = vrot.slane %v228_v1, 2 }
 0x52a   : > { %v230_v3 = vadd.f32 %v229_v2, %v228_v1 }
 0x52c   : > { %v231_v4 = vrot.slane %v230_v3, 1 }
 0x52e   : > { %v232_v5 = vadd.f32 %v231_v4, %v230_v3 }
 0x530   : > { %376 = vpush %v232_v5 }
 0x531   : > { %378 = vpush (!%p367_p10), %v253_v16 }
 0x55c   : > { %240 = sbr.rel (%p367_p10) target bundleno = 1386 (0x56a), region = 52 }
 0x561   : > { %s680_s9 = spop %376 }
 0x562   : > { %s236_s10 = smul.f32 0.125, %s680_s9  ;;  %s379_s12 = spop (!%p367_p10), %378 }
 0x563   : > { %s257_s13 = smul.f32 0.125, %s379_s12 }
 0x565   : > { %s259_s14 = ssub.f32 %s236_s10, %s257_s13 }
 0x567   : > { %s260_s15 = sadd.f32 %s259_s14, %s258_s11 }
 0x569   : > { %262 = sst [smem:[#allocation3]] %s260_s15 }
 0x56a PF: > { %p368_p12 = scmp.eq.s32.totalorder %s366_s8, 1 }
 0x56b   : > { %v268_v17 = vld [vmem:[#allocation2 + $0x8] sm:$0xff] (!%p368_p12)  ;;  %s285_s16 = sld [smem:[#allocation3]] (!%p368_p12) }
 0x56c   : > { %266 = sbr.rel (%p368_p12) target bundleno = 1744 (0x6d0), region = 56  ;;  %v269_v18 = vmul.f32 (!%p368_p12), %v268_v17, %v212_v53 }
 0x56e   : > { %270 = vadd.xlane.f32.xlu0 (!%p368_p12), %v269_v18 }
 0x5fb   : > { %v271_v19 = vpop.xlane.xlu0 %270 }
 0x5fc   : > { %v272_v20 = vsel %vm223_vm0, %v271_v19, 0.0 }
 0x5fd   : > { %273 = vadd.xlane.f32.xlu0 %v272_v20 }
 0x68a   : > { %v274_v21 = vpop.xlane.xlu0 %273 }
 0x68b   : > { %v275_v22 = vrot.slane %v274_v21, 4 }
 0x68d   : > { %v276_v23 = vadd.f32 %v275_v22, %v274_v21 }
 0x68f   : > { %v277_v24 = vrot.slane %v276_v23, 2 }
 0x691   : > { %v278_v25 = vadd.f32 %v277_v24, %v276_v23 }
 0x693   : > { %v279_v26 = vrot.slane %v278_v25, 1 }
 0x695   : > { %v280_v27 = vadd.f32 %v279_v26, %v278_v25 }
 0x697   : > { %380 = vpush %v280_v27 }
 0x6c8   : > { %s381_s17 = spop %380 }
 0x6c9   : > { %s284_s18 = smul.f32 0.125, %s381_s17 }
 0x6cb   : > { %s286_s19 = ssub.f32 %s236_s10, %s284_s18 }
 0x6cd   : > { %s287_s22 = sadd.f32 %s286_s19, %s285_s16 }
 0x6cf   : > { %289 = sst [smem:[#allocation3]] %s287_s22 }
 0x6d0 PF: > { %s294_s24 = sld [smem:[#allocation3]]  ;;  %p402_p13 = scmp.eq.s32.totalorder %s599_s0, 5 }
 0x6d1   : > { %s498_s29 = scalar_lea.hbm %s721_s2, 16 }
 0x6d2   : > { %p499_p1 = scmp.ne.s32.totalorder %s721_s2, %s498_s29  ;;  %p504_p7 = scmp.lt.u32.totalorder %s498_s29, %s721_s2 }
 0x6d4   : > { %p500_p3 = pnand %p499_p1, %p402_p13 }
 0x6d6   : > { %s295_s25 = smul.f32 0.16666667, %s294_s24  ;;  %p501_p5 = pneg %p500_p3 }
 0x6d8   : > { %389 = sst [smem:[#allocation9]] (%p402_p13), %s295_s25  ;;  %p506_p9 = pnand %p504_p7, %p501_p5 }
 0x6da   : > { %509 = shalt.err (!%p506_p9)
}
 0x6db   : > { %s555_s3 = smov [#allocation9]  }
 0x6dc   : > { %391 = dma.smem_to_hbm (%p402_p13), %s555_s3, 16, %s721_s2, [#allocation8]  }
 0x6dd   : > { %533 = dma.done.wait (%p402_p13), [#allocation8], 16  }
 0x6de   : > { %535 = vsyncadd (%p402_p13), [#allocation8], 4294967280 }
 0x6df   : > { %311 = sfence }
 0x6e0 PF: > { %p17_p2 = scmp.ge.s32.totalorder %s601_s23, 8   ;;  %s729_s19 = smov %s542_s20 }
 0x6e1   : > { %s730_s20 = smov %s546_s21  ;;  %s731_s21 = smov %s621_s4 }
 0x6e2   : > { %s732_s22 = smov %s601_s23  ;;  %19 = sbr.rel (!%p17_p2) target bundleno = 16 (0x10), region = 99 }
 0x6e9   :  { %317 = vsyncpa [#allocation7], 1 }
 0x6ea   :  { %319 = vsyncpa [#allocation7 + $0x1], 1 }
 0x6eb   :  { %320 = vsyncpa [#allocation8], 1 }
 0x6ec   :  { %322 = vsyncpa [#allocation8 + $0x1], 1 }

</bundles_post_ra>
